<compile_context>
chip_gen: v6e
topology: v6e:2x2x1
jax: 0.10.0
libtpu: 0.0.40
codegen_flags: <defaults>
</compile_context>

<pallas_src>
import functools

import numpy as np
import jax
import jax.numpy as jnp
from jax import lax
from jax.experimental import pallas as pl
from jax.experimental.pallas import tpu as pltpu


# ---------------------------------------------------------------------------
# Sobel weights exactly as constructed in Canny.sobel(): (4, 4, 3, 3) float32,
# block-diagonal (depthwise) with the same 3x3 kernel on every channel.
# Used only by the pure-JAX reference; the Pallas kernel exploits the
# depthwise structure directly.
# ---------------------------------------------------------------------------
_Z3 = [[0, 0, 0]] * 3
_SV = [[-1, 0, 1], [-2, 0, 2], [-1, 0, 1]]
_SH = [[1, 2, 1], [0, 0, 0], [-1, -2, -1]]

_SOBEL_V_CORE = [_SV + _Z3 * 3, _Z3 + _SV + _Z3 * 2, _Z3 * 2 + _SV + _Z3, _Z3 * 3 + _SV]
_SOBEL_H_CORE = [_SH + _Z3 * 3, _Z3 + _SH + _Z3 * 2, _Z3 * 2 + _SH + _Z3, _Z3 * 3 + _SH]

W_V = np.array(_SOBEL_V_CORE, dtype=np.float32).reshape(4, 4, 3, 3)
W_H = np.array(_SOBEL_H_CORE, dtype=np.float32).reshape(4, 4, 3, 3)


# ---------------------------------------------------------------------------
# Pallas kernel: one batch image (all C channels) per grid step.
#   pred_ref, tgt_ref : (1, C, H, W) VMEM tiles (native dtype)
#   out_ref           : (1, 1, W) f32 per-lane partial sums of |pred - tgt| * Edge
# ---------------------------------------------------------------------------
def _fft_loss_block_kernel(pred_ref, tgt_ref, out_ref, *, H, W):
    t = tgt_ref[0].astype(jnp.float32)    # (C, H, W)
    p = pred_ref[0].astype(jnp.float32)   # (C, H, W)
    two = jnp.float32(2.0)

    # ReflectionPad2d(1) halo rebuilt in-register: width-1 reflect means the
    # halo row/col is row/col 1 and H-2/W-2 (corners fall out correctly).
    xc = jnp.concatenate([t[:, :, 1:2], t, t[:, :, W - 2:W - 1]], axis=2)   # (C, H,   W+2)
    xr = jnp.concatenate([t[:, 1:2, :], t, t[:, H - 2:H - 1, :]], axis=1)   # (C, H+2, W)

    # Shared separable [1,2,1] smoothing (depthwise, identical per channel).
    sx = xc[:, :, 0:W] + two * xc[:, :, 1:W + 1] + xc[:, :, 2:W + 2]        # (C, H, W)
    sy = xr[:, 0:H, :] + two * xr[:, 1:H + 1, :] + xr[:, 2:H + 2, :]        # (C, H, W)

    # Central differences with reflected +-1 neighbours (reflect => zero at borders).
    sx_u = jnp.concatenate([sx[:, 1:2, :], sx[:, 0:H - 1, :]], axis=1)      # sx at row i-1
    sx_d = jnp.concatenate([sx[:, 1:H, :], sx[:, H - 2:H - 1, :]], axis=1)  # sx at row i+1
    sy_l = jnp.concatenate([sy[:, :, 1:2], sy[:, :, 0:W - 1]], axis=2)      # sy at col j-1
    sy_r = jnp.concatenate([sy[:, :, 1:W], sy[:, :, W - 2:W - 1]], axis=2)  # sy at col j+1

    g_h = sx_u - sx_d                     # horizontal Sobel response
    g_v = sy_r - sy_l                     # vertical Sobel response
    edge = jnp.sqrt(g_h * g_h + g_v * g_v)

    # |pred*E - tgt*E| == |pred - tgt| * E  since E >= 0.
    contrib = jnp.abs(p - t) * edge                                          # (C, H, W)
    # Sublane-side reduce only; the cross-lane reduce is finished in the wrapper.
    out_ref[...] = jnp.sum(contrib, axis=(0, 1), keepdims=True)              # (1, 1, W)


def fft_loss(pred, target):
    """pred, target: (B, C, H, W) NCHW, any float dtype. Returns scalar f32 loss."""
    B, C, H, W = pred.shape
    if H < 2 or W < 2:
        raise ValueError("ReflectionPad2d(1) requires H >= 2 and W >= 2")

    kernel = functools.partial(_fft_loss_block_kernel, H=H, W=W)

    itemsize = jnp.dtype(pred.dtype).itemsize
    tile = C * H * W
    # 2 inputs x 2 pipeline buffers (native dtype) + ~16 live f32 intermediates + output.
    vmem_need = 2 * 2 * tile * itemsize + 16 * tile * 4 + 2 * W * 4
    vmem_limit = int(min(max(2 * vmem_need, 32 * 1024 * 1024), 64 * 1024 * 1024))

    n = B * C * H * W
    cost = pl.CostEstimate(
        flops=12 * n,
        transcendentals=n,
        bytes_accessed=int(n * itemsize * 2 + B * W * 4),
    )

    partials = pl.pallas_call(
        kernel,
        out_shape=jax.ShapeDtypeStruct((B, 1, W), jnp.float32),
        grid_spec=pltpu.PrefetchScalarGridSpec(
            num_scalar_prefetch=0,
            grid=(B,),
            in_specs=[
                pl.BlockSpec((1, C, H, W), lambda b: (b, 0, 0, 0)),
                pl.BlockSpec((1, C, H, W), lambda b: (b, 0, 0, 0)),
            ],
            out_specs=pl.BlockSpec((1, 1, W), lambda b: (b, 0, 0)),
        ),
        compiler_params=pltpu.CompilerParams(
            dimension_semantics=("parallel",),
            vmem_limit_bytes=vmem_limit),
        cost_estimate=cost,
    )(pred, target)

    # Finish the reduction (cross-lane + cross-batch) and normalize -> mean.
    return jnp.sum(partials, dtype=jnp.float32) / jnp.float32(n)


# ---------------------------------------------------------------------------
# Pure-JAX reference: full (4,4,3,3) conv exactly like the PyTorch module.
# ---------------------------------------------------------------------------
def fft_loss_ref(pred, target):
    pred = pred.astype(jnp.float32)
    target = target.astype(jnp.float32)
    tpad = jnp.pad(target, ((0, 0), (0, 0), (1, 1), (1, 1)), mode="reflect")
    dn = lax.conv_dimension_numbers(tpad.shape, W_V.shape, ("NCHW", "OIHW", "NCHW"))
    out_v = lax.conv_general_dilated(tpad, jnp.asarray(W_V), (1, 1), "VALID",
                                     dimension_numbers=dn)
    out_h = lax.conv_general_dilated(tpad, jnp.asarray(W_H), (1, 1), "VALID",
                                     dimension_numbers=dn)
    edge = jnp.sqrt(out_h * out_h + out_v * out_v)
    return jnp.mean(jnp.abs(pred * edge - target * edge))


if __name__ == "__main__":
    key = jax.random.PRNGKey(0)
    k1, k2 = jax.random.split(key)
    B, C, H, W = 2, 4, 16, 16
    pred = jax.random.uniform(k1, (B, C, H, W), dtype=jnp.float32)
    target = jax.random.uniform(k2, (B, C, H, W), dtype=jnp.float32)

    loss = jax.block_until_ready(jax.jit(fft_loss)(pred, target))

    ref = jax.block_until_ready(fft_loss_ref(pred, target))
    np.testing.assert_allclose(np.asarray(loss), np.asarray(ref), rtol=1e-5, atol=1e-6)

    print("KERNEL_OK")
</pallas_src>

<mosaic_0001>
module attributes {stable_mosaic.version = 11 : i64} {
  func.func @_fft_loss_block_kernel(%arg0: i32, %arg1: memref<1x4x16x16xf32, #tpu.memory_space<vmem>>, %arg2: memref<1x4x16x16xf32, #tpu.memory_space<vmem>>, %arg3: memref<1x1x16xf32, #tpu.memory_space<vmem>>) attributes {dimension_semantics = [#tpu.dimension_semantics<parallel>], iteration_bounds = array<i64: 2>, scalar_prefetch = 0 : i64, scratch_operands = 0 : i64, tpu.core_type = #tpu.core_type<tc>, window_params = [{transform_indices = @transform_0, window_bounds = array<i64: 1, 4, 16, 16>}, {transform_indices = @transform_1, window_bounds = array<i64: 1, 4, 16, 16>}, {transform_indices = @transform_2, window_bounds = array<i64: 1, 1, 16>}]} {
    %c0 = arith.constant 0 : index
    %c0_0 = arith.constant 0 : index
    %c0_1 = arith.constant 0 : index
    %c0_2 = arith.constant 0 : index
    %0 = vector.load %arg2[%c0, %c0_0, %c0_1, %c0_2] : memref<1x4x16x16xf32, #tpu.memory_space<vmem>>, vector<1x4x16x16xf32>
    %1 = vector.shape_cast %0 : vector<1x4x16x16xf32> to vector<4x16x16xf32>
    %c0_3 = arith.constant 0 : index
    %c0_4 = arith.constant 0 : index
    %c0_5 = arith.constant 0 : index
    %c0_6 = arith.constant 0 : index
    %2 = vector.load %arg1[%c0_3, %c0_4, %c0_5, %c0_6] : memref<1x4x16x16xf32, #tpu.memory_space<vmem>>, vector<1x4x16x16xf32>
    %3 = vector.shape_cast %2 : vector<1x4x16x16xf32> to vector<4x16x16xf32>
    %4 = vector.extract_strided_slice %1 {offsets = [0, 0, 1], sizes = [4, 16, 1], strides = [1, 1, 1]} : vector<4x16x16xf32> to vector<4x16x1xf32>
    %5 = vector.extract_strided_slice %1 {offsets = [0, 0, 14], sizes = [4, 16, 1], strides = [1, 1, 1]} : vector<4x16x16xf32> to vector<4x16x1xf32>
    %6 = tpu.concatenate %4, %1, %5 in 2 : vector<4x16x1xf32>, vector<4x16x16xf32>, vector<4x16x1xf32> -> vector<4x16x18xf32>
    %7 = vector.extract_strided_slice %1 {offsets = [0, 1, 0], sizes = [4, 1, 16], strides = [1, 1, 1]} : vector<4x16x16xf32> to vector<4x1x16xf32>
    %8 = vector.extract_strided_slice %1 {offsets = [0, 14, 0], sizes = [4, 1, 16], strides = [1, 1, 1]} : vector<4x16x16xf32> to vector<4x1x16xf32>
    %9 = tpu.concatenate %7, %1, %8 in 1 : vector<4x1x16xf32>, vector<4x16x16xf32>, vector<4x1x16xf32> -> vector<4x18x16xf32>
    %10 = vector.extract_strided_slice %6 {offsets = [0, 0, 0], sizes = [4, 16, 16], strides = [1, 1, 1]} : vector<4x16x18xf32> to vector<4x16x16xf32>
    %11 = vector.extract_strided_slice %6 {offsets = [0, 0, 1], sizes = [4, 16, 16], strides = [1, 1, 1]} : vector<4x16x18xf32> to vector<4x16x16xf32>
    %cst = arith.constant 2.000000e+00 : f32
    %12 = vector.broadcast %cst : f32 to vector<4x16x16xf32>
    %13 = arith.mulf %12, %11 : vector<4x16x16xf32>
    %14 = arith.addf %10, %13 : vector<4x16x16xf32>
    %15 = vector.extract_strided_slice %6 {offsets = [0, 0, 2], sizes = [4, 16, 16], strides = [1, 1, 1]} : vector<4x16x18xf32> to vector<4x16x16xf32>
    %16 = arith.addf %14, %15 : vector<4x16x16xf32>
    %17 = vector.extract_strided_slice %9 {offsets = [0, 0, 0], sizes = [4, 16, 16], strides = [1, 1, 1]} : vector<4x18x16xf32> to vector<4x16x16xf32>
    %18 = vector.extract_strided_slice %9 {offsets = [0, 1, 0], sizes = [4, 16, 16], strides = [1, 1, 1]} : vector<4x18x16xf32> to vector<4x16x16xf32>
    %cst_7 = arith.constant 2.000000e+00 : f32
    %19 = vector.broadcast %cst_7 : f32 to vector<4x16x16xf32>
    %20 = arith.mulf %19, %18 : vector<4x16x16xf32>
    %21 = arith.addf %17, %20 : vector<4x16x16xf32>
    %22 = vector.extract_strided_slice %9 {offsets = [0, 2, 0], sizes = [4, 16, 16], strides = [1, 1, 1]} : vector<4x18x16xf32> to vector<4x16x16xf32>
    %23 = arith.addf %21, %22 : vector<4x16x16xf32>
    %24 = vector.extract_strided_slice %16 {offsets = [0, 1, 0], sizes = [4, 1, 16], strides = [1, 1, 1]} : vector<4x16x16xf32> to vector<4x1x16xf32>
    %25 = vector.extract_strided_slice %16 {offsets = [0, 0, 0], sizes = [4, 15, 16], strides = [1, 1, 1]} : vector<4x16x16xf32> to vector<4x15x16xf32>
    %26 = tpu.concatenate %24, %25 in 1 : vector<4x1x16xf32>, vector<4x15x16xf32> -> vector<4x16x16xf32>
    %27 = vector.extract_strided_slice %16 {offsets = [0, 1, 0], sizes = [4, 15, 16], strides = [1, 1, 1]} : vector<4x16x16xf32> to vector<4x15x16xf32>
    %28 = vector.extract_strided_slice %16 {offsets = [0, 14, 0], sizes = [4, 1, 16], strides = [1, 1, 1]} : vector<4x16x16xf32> to vector<4x1x16xf32>
    %29 = tpu.concatenate %27, %28 in 1 : vector<4x15x16xf32>, vector<4x1x16xf32> -> vector<4x16x16xf32>
    %30 = vector.extract_strided_slice %23 {offsets = [0, 0, 1], sizes = [4, 16, 1], strides = [1, 1, 1]} : vector<4x16x16xf32> to vector<4x16x1xf32>
    %31 = vector.extract_strided_slice %23 {offsets = [0, 0, 0], sizes = [4, 16, 15], strides = [1, 1, 1]} : vector<4x16x16xf32> to vector<4x16x15xf32>
    %32 = tpu.concatenate %30, %31 in 2 : vector<4x16x1xf32>, vector<4x16x15xf32> -> vector<4x16x16xf32>
    %33 = vector.extract_strided_slice %23 {offsets = [0, 0, 1], sizes = [4, 16, 15], strides = [1, 1, 1]} : vector<4x16x16xf32> to vector<4x16x15xf32>
    %34 = vector.extract_strided_slice %23 {offsets = [0, 0, 14], sizes = [4, 16, 1], strides = [1, 1, 1]} : vector<4x16x16xf32> to vector<4x16x1xf32>
    %35 = tpu.concatenate %33, %34 in 2 : vector<4x16x15xf32>, vector<4x16x1xf32> -> vector<4x16x16xf32>
    %36 = arith.subf %26, %29 : vector<4x16x16xf32>
    %37 = arith.subf %35, %32 : vector<4x16x16xf32>
    %38 = arith.mulf %36, %36 : vector<4x16x16xf32>
    %39 = arith.mulf %37, %37 : vector<4x16x16xf32>
    %40 = arith.addf %38, %39 : vector<4x16x16xf32>
    %41 = math.sqrt %40 : vector<4x16x16xf32>
    %42 = arith.subf %3, %1 : vector<4x16x16xf32>
    %43 = math.absf %42 : vector<4x16x16xf32>
    %44 = arith.mulf %43, %41 : vector<4x16x16xf32>
    %cst_8 = arith.constant dense<0.000000e+00> : vector<16xf32>
    %45 = vector.multi_reduction <add>, %44, %cst_8 [0, 1] : vector<4x16x16xf32> to vector<16xf32>
    %46 = vector.shape_cast %45 : vector<16xf32> to vector<1x1x16xf32>
    %c0_9 = arith.constant 0 : index
    %c0_10 = arith.constant 0 : index
    %c0_11 = arith.constant 0 : index
    %47 = vector.load %arg3[%c0_9, %c0_10, %c0_11] : memref<1x1x16xf32, #tpu.memory_space<vmem>>, vector<1x1x16xf32>
    tpu.vector_store %arg3[%c0_9, %c0_10, %c0_11], %46 {strides = array<i32>} : memref<1x1x16xf32, #tpu.memory_space<vmem>>, vector<1x1x16xf32>,
    return
  }
  func.func @transform_0(%arg0: i32) -> (i32, i32, i32, i32) {
    %c0_i32 = arith.constant 0 : i32
    %c0_i32_0 = arith.constant 0 : i32
    %c0_i32_1 = arith.constant 0 : i32
    %c0_i32_2 = arith.constant 0 : i32
    return %arg0, %c0_i32, %c0_i32_0, %c0_i32_1 : i32, i32, i32, i32
  }
  func.func @transform_1(%arg0: i32) -> (i32, i32, i32, i32) {
    %c0_i32 = arith.constant 0 : i32
    %c0_i32_0 = arith.constant 0 : i32
    %c0_i32_1 = arith.constant 0 : i32
    %c0_i32_2 = arith.constant 0 : i32
    return %arg0, %c0_i32, %c0_i32_0, %c0_i32_1 : i32, i32, i32, i32
  }
  func.func @transform_2(%arg0: i32) -> (i32, i32, i32) {
    %c0_i32 = arith.constant 0 : i32
    %c0_i32_0 = arith.constant 0 : i32
    %c0_i32_1 = arith.constant 0 : i32
    return %arg0, %c0_i32, %c0_i32_0 : i32, i32, i32
  }
}

</mosaic_0001>

<bundles_post_ra>
// kernel: fft_loss.1
= control target key start
LH: loop header
LB: loop body
LE: loop exit
PB: predicated region body
PF: predicated region fallthrough
CT: control target
= control target key end

     0   :  { %7 = vsyncpa [#allocation3], 0  ;;  %s1670_s0 = inlined_call_operand.hbm [shape: f32[2,4,16,16], index: 0, kind: input, shape index: {}]   ;;  %s1671_s1 = inlined_call_operand.hbm [shape: f32[2,4,16,16], index: 1, kind: input, shape index: {}]   ;;  %s1672_s2 = inlined_call_operand.vmem [shape: f32[2,1,16], index: 2, kind: output, shape index: {}]  }
   0x1   :  { %9 = vsyncpa [#allocation3 + $0x1], 0 }
   0x2   :  { %10 = vsyncpa [#allocation5], 0 }
   0x3   :  { %12 = vsyncpa [#allocation5 + $0x1], 0  ;;  %s1121_s9 = smov 0   ;;  %s1123_s10 = smov 0  }
   0x4   :  { %s1125_s11 = smov 0   ;;  %s1127_s12 = smov 0  }
   0x5 LB: > { %s1140_s13 = sadd.s32 4294967295, %s1096_s12   ;;  %s1143_s14 = sadd.s32 1, %s1096_s12   ;;  %s1096_s12 = sphi %s1127_s12, %s1682_s12   ;;  %s1092_s11 = sphi %s1125_s11, %s1681_s11   ;;  %s1088_s10 = sphi %s1123_s10, %s1680_s10   ;;  %s1084_s9 = sphi %s1121_s9, %s1679_s9  }
   0x6   : > { %s22_s15 = ssub.s32 %s1096_s12, %s1143_s14  ;;  %s25_s16 = sadd.s32 1, %s1092_s11 }
   0x7   : > { %p23_p0 = scmp.eq.s32.totalorder %s22_s15, 0  ;;  %p32_p1 = scmp.ne.s32.totalorder %s1092_s11, %s1088_s10 }
   0x8   : > { %p33_p2 = scmp.eq.s32.totalorder %s1096_s12, 0  ;;  %p38_p3 = scmp.ne.s32.totalorder %s1088_s10, %s1084_s9 }
   0x9   : > { %s1153_s17 = scalar_select %p23_p0, %s1092_s11, %s25_s16  }
   0xa   : > { %p34_p4 = por %p33_p2, %p32_p1  ;;  %p39_p5 = scmp.eq.s32.totalorder %s1140_s13, 0 }
   0xb   : > { %p947_p6 = scmp.lt.s32.totalorder %s1096_s12, 2  ;;  %s1162_s19 = sand.u32 1, %s1092_s11  }
   0xc   : > { %p1157_p7 = por %p39_p5, %p38_p3  ;;  %s923_s20 = sshll.u32 %s1162_s19, 6 }
   0xd   : > { %s934_s21 = sshll.u32 %s1096_s12, 10  ;;  %s118_s25 = scalar_lea.vmem [#allocation2], %s923_s20 }
   0xe   : > { %s1674_s18 = scalar_select %p1157_p7, 1, 0 }
   0xf   : > { %s1171_s24 = scalar_lea.hbm %s1670_s0, %s934_s21  ;;  %s125_s26 = sshll.u32 %s118_s25, 4  ;;  %s1175_s26 = int_to_ptr.vmem [resolvable:$true] %s125_s26 }
  0x10   : > { %p1177_p8 = pnand %p947_p6, %p34_p4  ;;  %s115_s28 = scalar_lea.sflag [#allocation3], %s1162_s19 }
  0x11   : > { %s1002_s29 = scalar_lea.hbm %s1171_s24, 1024  ;;  %s1007_s4 = scalar_lea.hbm %s1670_s0, 2048 }
  0x12   : > { %p1003_p10 = scmp.ne.s32.totalorder %s1171_s24, %s1002_s29  ;;  %p1004_p11 = pneg %p1177_p8 }
  0x13   : > { %p1008_p0 = scmp.lt.s32.totalorder %s1171_s24, %s1670_s0  ;;  %p1009_p1 = scmp.lt.s32.totalorder %s1007_s4, %s1002_s29 }
  0x14   : > { %p1005_p12 = pnand %p1004_p11, %p1003_p10 }
  0x15   : > { %p1010_p2 = por %p1009_p1, %p1008_p0 }
  0x16   : > { %p1006_p13 = pneg %p1005_p12 }
  0x18   : > { %p1011_p3 = pnand %p1010_p2, %p1006_p13 }
  0x1a   : > { %1014 = shalt.err (!%p1011_p3)
}
  0x1b   : > { %s1015_s7 = scalar_lea.vmem %s1175_s26, 1024  ;;  %s1098_s8 = smov [#allocation2]  }
  0x1c   : > { %p1016_p4 = scmp.ne.s32.totalorder %s1175_s26, %s1015_s7  ;;  %s1020_s9 = sshll.u32 %s1098_s8, 4  ;;  %s1021_s9 = int_to_ptr.vmem [resolvable:$false] %s1020_s9 }
  0x1d   : > { %s1022_s15 = scalar_lea.vmem %s1021_s9, 2048  ;;  %p1023_p10 = scmp.lt.s32.totalorder %s1175_s26, %s1021_s9 }
  0x1e   : > { %p1018_p5 = pnand %p1016_p4, %p1004_p11  ;;  %p1024_p12 = scmp.lt.s32.totalorder %s1022_s15, %s1015_s7 }
  0x20   : > { %p1019_p6 = pneg %p1018_p5  ;;  %p1025_p9 = por %p1024_p12, %p1023_p10 }
  0x22   : > { %p1026_p0 = pnand %p1025_p9, %p1019_p6 }
  0x24   : > { %1029 = shalt.err (!%p1026_p0)
}
  0x25   : > { %s1099_s16 = smov 128   ;;  %s1100_s22 = smov 8  }
  0x26   : > { %943 = dma.hbm_to_vmem [thread:$0]  (!%p1177_p8), %s1171_s24, 1024, %s1175_s26, %s115_s28, %s1099_s16, %s1099_s16, %s1100_s22  }
  0x27   : > { %p154_p9 = scmp.lt.s32.totalorder %s1096_s12, 3  ;;  %s1218_s29 = scalar_lea.hbm %s1671_s1, %s934_s21 }
  0x28   : > { %p1676_p13 = scmp.ge.s32.totalorder %s1096_s12, 1  ;;  %s139_s3 = scalar_lea.vmem [#allocation4], %s923_s20 }
  0x29   : > { %s146_s4 = sshll.u32 %s139_s3, 4  ;;  %s136_s24 = scalar_lea.sflag [#allocation5], %s1162_s19  ;;  %s1228_s4 = int_to_ptr.vmem [resolvable:$true] %s146_s4 }
  0x2a   : > { %p1222_p1 = pnand %p1676_p13, %p154_p9  ;;  %s1030_s26 = scalar_lea.hbm %s1218_s29, 1024 }
  0x2b   : > { %p1031_p2 = scmp.ne.s32.totalorder %s1218_s29, %s1030_s26  ;;  %s1035_s28 = scalar_lea.hbm %s1671_s1, 2048 }
  0x2c   : > { %p1036_p5 = scmp.lt.s32.totalorder %s1218_s29, %s1671_s1  ;;  %p1037_p6 = scmp.lt.s32.totalorder %s1035_s28, %s1030_s26 }
  0x2d   : > { %p1033_p3 = pnand %p1031_p2, %p1004_p11 }
  0x2e   : > { %p1038_p10 = por %p1037_p6, %p1036_p5 }
  0x2f   : > { %p1034_p4 = pneg %p1033_p3 }
  0x31   : > { %p1039_p12 = pnand %p1038_p10, %p1034_p4 }
  0x33   : > { %1042 = shalt.err (!%p1039_p12)
}
  0x34   : > { %s1043_s19 = scalar_lea.vmem %s1228_s4, 1024  ;;  %s1101_s20 = smov [#allocation4]  }
  0x35   : > { %p1044_p0 = scmp.ne.s32.totalorder %s1228_s4, %s1043_s19  ;;  %s1048_s7 = sshll.u32 %s1101_s20, 4  ;;  %s1049_s7 = int_to_ptr.vmem [resolvable:$false] %s1048_s7 }
  0x36   : > { %s1050_s8 = scalar_lea.vmem %s1049_s7, 2048  ;;  %p1051_p2 = scmp.lt.s32.totalorder %s1228_s4, %s1049_s7 }
  0x37   : > { %p1046_p9 = pnand %p1044_p0, %p1004_p11  ;;  %p1052_p3 = scmp.lt.s32.totalorder %s1050_s8, %s1043_s19 }
  0x39   : > { %p1047_p13 = pneg %p1046_p9  ;;  %p1053_p7 = por %p1052_p3, %p1051_p2 }
  0x3b   : > { %p1054_p5 = pnand %p1053_p7, %p1047_p13 }
  0x3d   : > { %1057 = shalt.err (!%p1054_p5)
}
  0x3e   : > { %946 = dma.hbm_to_vmem [thread:$0]  (!%p1177_p8), %s1218_s29, 1024, %s1228_s4, %s136_s24, %s1099_s16, %s1099_s16, %s1100_s22  }
  0x3f   : > { %158 = sbr.rel (%p1222_p1) target bundleno = 421 (0x1a5), region = 28  ;;  %s160_s9 = sand.u32 (!%p1222_p1), 1, %s1088_s10  }
  0x40   : > { %s930_s15 = sshll.u32 (!%p1222_p1), %s160_s9, 6  ;;  %s161_s23 = scalar_lea.sflag (!%p1222_p1), [#allocation3], %s160_s9 }
  0x41   : > { %s1259_s25 = scalar_lea.vmem (!%p1222_p1), [#allocation2], %s930_s15  ;;  %p1678_p7 = scmp.ne.s32.totalorder (!%p1222_p1), %s1674_s18, 0 }
  0x44   : > { %1075 = dma.done.wait (%p1678_p7), %s161_s23, 1024  }
  0x45   : > { %1077 = vsyncadd (%p1678_p7), %s161_s23, 4294966272  ;;  %s170_s27 = scalar_lea.sflag [#allocation5], %s160_s9  ;;  %s1265_s3 = scalar_lea.vmem [#allocation4], %s930_s15 }
  0x46   : > { %1079 = dma.done.wait (%p1678_p7), %s170_s27, 1024  }
  0x47   : > { %1081 = vsyncadd (%p1678_p7), %s170_s27, 4294966272  ;;  %v1272_v0 = vld [vmem:[%s1265_s3] sm:$0xff]  ;;  %s1102_s16 = smov 1   ;;  %s1103_s22 = smov 127   ;;  %v1279_v1 = vld [vmem:[%s1265_s3 + $0x8] sm:$0xff]  ;;  %vm322_vm0 = vcmask 1040384  }
  0x48   : > { %248 = vrot.lane.b32.xlu1 %v1272_v0, %s1102_s16  ;;  %224 = vrot.lane.b32.xlu0 %v1272_v0, %s1103_s22  ;;  %s1104_s18 = smov 3   ;;  %v1290_v2 = vld [vmem:[%s1265_s3 + $0x18] sm:$0xff]  ;;  %v1293_v3 = vld [vmem:[%s1265_s3 + $0x10] sm:$0xff]  ;;  %v323_v6 = vrot.slane %v1272_v0, 7  ;;  %v324_v7 = vrot.slane %v1279_v1, 7  ;;  %v347_v8 = vrot.slane %v1279_v1, 5 }
  0x49   : > { %v1308_v4 = vld [vmem:[%s1265_s3 + $0x28] sm:$0xff]  ;;  %v1311_v5 = vld [vmem:[%s1265_s3 + $0x20] sm:$0xff]  ;;  %v314_v9 = vrot.slane %v1272_v0, 1  ;;  %v315_v16 = vrot.slane %v1293_v3, 1  ;;  %v326_v17 = vrot.slane %v1293_v3, 7  ;;  %v327_v18 = vrot.slane %v1290_v2, 7 }
  0x4a   : > { %v325_v10 = vsel %vm322_vm0, %v323_v6, %v324_v7  ;;  %v359_v11 = vsel %vm322_vm0, %v324_v7, %v347_v8  ;;  %v348_v21 = vrot.slane %v1290_v2, 5  ;;  %v1337_v22 = vld [vmem:[%s1265_s3 + $0x38] sm:$0xff]  ;;  %v1340_v23 = vld [vmem:[%s1265_s3 + $0x30] sm:$0xff]  ;;  %vm475_vm1 = vcmask 1046528   ;;  %s1105_s29 = smov 126   ;;  %p197_p8 = scmp.lt.s32.totalorder %s1140_s13, 1 }
  0x4b   : > { %v355_v12 = vsel %vm322_vm0, %v314_v9, %v323_v6  ;;  %v452_v13 = vmul.f32 2.0, %v325_v10  ;;  %v453_v14 = vmul.f32 2.0, %v359_v11  ;;  %v522_v25 = vrot.slane %v325_v10, 2 }
  0x4c   : > { %250 = vrot.lane.b32.xlu1 %v1279_v1, %s1102_s16  ;;  %226 = vrot.lane.b32.xlu0 %v1279_v1, %s1103_s22  ;;  %v451_v15 = vmul.f32 2.0, %v355_v12  ;;  %v524_v26 = vrot.slane %v359_v11, 2  ;;  %v1343_v27 = vsel %vm322_vm0, %v326_v17, %v327_v18  ;;  %v356_v28 = vsel %vm322_vm0, %v315_v16, %v326_v17  ;;  %s1684_s13 = smov (!%p197_p8, %s1140_s13), 1 }
  0x4d   : > { %v477_v19 = vrot.slane %v452_v13, 1  ;;  %v479_v20 = vrot.slane %v453_v14, 1  ;;  %vm520_vm2 = vcmask 1045504   ;;  %v521_v29 = vrot.slane %v355_v12, 2  ;;  %s199_s24 = scalar_lea.vmem %s1672_s2, %s1684_s13 }
  0x4e   : > { %v476_v24 = vrot.slane %v451_v15, 1  ;;  %v360_v31 = vsel %vm322_vm0, %v327_v18, %v348_v21  ;;  %v316_v32 = vrot.slane %v1311_v5, 1  ;;  %v454_v34 = vmul.f32 2.0, %v356_v28 }
  0x4f   : > { %v480_v30 = vsel %vm475_vm1, %v477_v19, %v479_v20  ;;  %v455_v35 = vmul.f32 2.0, %v1343_v27  ;;  %v329_v36 = vrot.slane %v1311_v5, 7  ;;  %v525_v37 = vsel %vm520_vm2, %v522_v25, %v524_v26 }
  0x50   : > { %274 = vrot.lane.b32.xlu1 %v1279_v1, %s1104_s18  ;;  %272 = vrot.lane.b32.xlu0 %v1272_v0, %s1104_s18  ;;  %v478_v33 = vsel %vm475_vm1, %v476_v24, %v477_v19  ;;  %v330_v38 = vrot.slane %v1308_v4, 7  ;;  %v505_v39 = vadd.f32 %v480_v30, %v325_v10  ;;  %v523_v40 = vsel %vm520_vm2, %v521_v29, %v522_v25 }
  0x51   : > { %v527_v41 = vrot.slane %v1343_v27, 2  ;;  %v456_v42 = vmul.f32 2.0, %v360_v31  ;;  %v504_v43 = vadd.f32 %v478_v33, %v355_v12  ;;  %v317_v44 = vrot.slane %v1340_v23, 1 }
  0x52   : > { %v332_v45 = vrot.slane %v1340_v23, 7  ;;  %v333_v46 = vrot.slane %v1337_v22, 7  ;;  %v481_v47 = vrot.slane %v454_v34, 1  ;;  %v482_v48 = vrot.slane %v455_v35, 1 }
  0x53   : > { %v526_v49 = vrot.slane %v356_v28, 2  ;;  %v357_v50 = vsel %vm322_vm0, %v316_v32, %v329_v36  ;;  %v1369_v51 = vsel %vm322_vm0, %v329_v36, %v330_v38  ;;  %v349_v52 = vrot.slane %v1308_v4, 5 }
  0x54   : > { %230 = vrot.lane.b32.xlu1 %v1290_v2, %s1103_s22  ;;  %228 = vrot.lane.b32.xlu0 %v1293_v3, %s1103_s22  ;;  %v334_v53 = vsel %vm322_vm0, %v332_v45, %v333_v46  ;;  %v358_v54 = vsel %vm322_vm0, %v317_v44, %v332_v45  ;;  %v550_v55 = vadd.f32 %v525_v37, %v505_v39  ;;  %v484_v59 = vrot.slane %v456_v42, 1 }
  0x55   : > { %v460_v56 = vmul.f32 2.0, %v358_v54  ;;  %v461_v57 = vmul.f32 2.0, %v334_v53  ;;  %v549_v58 = vadd.f32 %v523_v40, %v504_v43  ;;  %v457_v60 = vmul.f32 2.0, %v357_v50 }
  0x56   : > { %v350_v61 = vrot.slane %v1337_v22, 5  ;;  %v483_v62 = vsel %vm475_vm1, %v481_v47, %v482_v48  ;;  %v458_v63 = vmul.f32 2.0, %v1369_v51  ;;  %v528_v8 = vsel %vm520_vm2, %v526_v49, %v527_v41 }
  0x57   : > { %v491_v6 = vrot.slane %v460_v56, 1  ;;  %v492_v7 = vrot.slane %v461_v57, 1  ;;  %v529_v9 = vrot.slane %v360_v31, 2  ;;  %v361_v10 = vsel %vm322_vm0, %v330_v38, %v349_v52 }
  0x58   : > { %254 = vrot.lane.b32.xlu1 %v1290_v2, %s1102_s16  ;;  %252 = vrot.lane.b32.xlu0 %v1293_v3, %s1102_s16  ;;  %v362_v11 = vsel %vm322_vm0, %v333_v46, %v350_v61  ;;  %v536_v13 = vrot.slane %v358_v54, 2  ;;  %v537_v14 = vrot.slane %v334_v53, 2  ;;  %v506_v16 = vadd.f32 %v483_v62, %v356_v28 }
  0x59   : > { %v493_v12 = vsel %vm475_vm1, %v491_v6, %v492_v7  ;;  %v462_v15 = vmul.f32 2.0, %v362_v11  ;;  %v485_v17 = vsel %vm475_vm1, %v482_v48, %v484_v59  ;;  %v486_v18 = vrot.slane %v457_v60, 1 }
  0x5a   : > { %v510_v19 = vadd.f32 %v493_v12, %v358_v54  ;;  %v487_v20 = vrot.slane %v458_v63, 1  ;;  %v459_v21 = vmul.f32 2.0, %v361_v10  ;;  %v538_v24 = vsel %vm520_vm2, %v536_v13, %v537_v14 }
  0x5b   : > { %v494_v25 = vrot.slane %v462_v15, 1  ;;  %v530_v29 = vsel %vm520_vm2, %v527_v41, %v529_v9  ;;  %v539_v31 = vrot.slane %v362_v11, 2  ;;  %v551_v28 = vadd.f32 %v528_v8, %v506_v16 }
  0x5c   : > { %278 = vrot.lane.b32.xlu1 %v1290_v2, %s1104_s18  ;;  %276 = vrot.lane.b32.xlu0 %v1293_v3, %s1104_s18  ;;  %v1389_v26 = vadd.f32 %v538_v24, %v510_v19  ;;  %v507_v32 = vadd.f32 %v485_v17, %v1343_v27  ;;  %v531_v33 = vrot.slane %v357_v50, 2  ;;  %v488_v35 = vsel %vm475_vm1, %v486_v18, %v487_v20 }
  0x5d   : > { %v495_v30 = vsel %vm475_vm1, %v492_v7, %v494_v25  ;;  %v532_v36 = vrot.slane %v1369_v51, 2  ;;  %v489_v37 = vrot.slane %v459_v21, 1  ;;  %v540_v38 = vsel %vm520_vm2, %v537_v14, %v539_v31 }
  0x5e   : > { %v511_v34 = vadd.f32 %v495_v30, %v334_v53  ;;  %v552_v40 = vadd.f32 %v530_v29, %v507_v32  ;;  %v508_v41 = vadd.f32 %v488_v35, %v357_v50  ;;  %v534_v43 = vrot.slane %v361_v10, 2 }
  0x5f   : > { %v533_v42 = vsel %vm520_vm2, %v531_v33, %v532_v36  ;;  %v490_v27 = vsel %vm475_vm1, %v487_v20, %v489_v37  ;;  %vm296_vm3 = vcmask 7168   ;;  %vm305_vm4 = vcmask 138240  }
  0x60   : > { %234 = vrot.lane.b32.xlu1 %v1308_v4, %s1103_s22  ;;  %232 = vrot.lane.b32.xlu0 %v1311_v5, %s1103_s22  ;;  %v1399_v39 = vadd.f32 %v540_v38, %v511_v34  ;;  %v553_v44 = vadd.f32 %v533_v42, %v508_v41  ;;  %v509_v45 = vadd.f32 %v490_v27, %v1369_v51  ;;  %vm685_vm5 = vcmask 121856  }
  0x61   : > { %v535_v46 = vsel %vm520_vm2, %v532_v36, %v534_v43  ;;  %vm814_vm6 = vcmask 130048  }
  0x62   : > { %v554_v47 = vadd.f32 %v535_v46, %v509_v45 }
  0x64   : > { %258 = vrot.lane.b32.xlu1 %v1308_v4, %s1102_s16  ;;  %256 = vrot.lane.b32.xlu0 %v1311_v5, %s1102_s16 }
  0x68   : > { %282 = vrot.lane.b32.xlu1 %v1308_v4, %s1104_s18  ;;  %280 = vrot.lane.b32.xlu0 %v1311_v5, %s1104_s18 }
  0x6c   : > { %238 = vrot.lane.b32.xlu1 %v1337_v22, %s1103_s22  ;;  %236 = vrot.lane.b32.xlu0 %v1340_v23, %s1103_s22 }
  0x70   : > { %262 = vrot.lane.b32.xlu1 %v1337_v22, %s1102_s16  ;;  %260 = vrot.lane.b32.xlu0 %v1340_v23, %s1102_s16 }
  0x74   : > { %286 = vrot.lane.b32.xlu1 %v1337_v22, %s1104_s18  ;;  %284 = vrot.lane.b32.xlu0 %v1340_v23, %s1104_s18 }
  0x78   : > { %631 = vrot.lane.b32.xlu1 %v550_v55, %s1103_s22  ;;  %629 = vrot.lane.b32.xlu0 %v549_v58, %s1103_s22 }
  0x7c   : > { %655 = vrot.lane.b32.xlu1 %v550_v55, %s1102_s16  ;;  %653 = vrot.lane.b32.xlu0 %v549_v58, %s1102_s16 }
  0x80   : > { %657 = vrot.lane.b32.xlu1 %v551_v28, %s1102_s16  ;;  %633 = vrot.lane.b32.xlu0 %v551_v28, %s1103_s22 }
  0x84   : > { %659 = vrot.lane.b32.xlu1 %v552_v40, %s1102_s16  ;;  %635 = vrot.lane.b32.xlu0 %v552_v40, %s1103_s22 }
  0x88   : > { %661 = vrot.lane.b32.xlu1 %v553_v44, %s1102_s16  ;;  %637 = vrot.lane.b32.xlu0 %v553_v44, %s1103_s22 }
  0x8c   : > { %663 = vrot.lane.b32.xlu1 %v554_v47, %s1102_s16  ;;  %639 = vrot.lane.b32.xlu0 %v554_v47, %s1103_s22 }
  0xba   : > { %v249_v48 = vpop.permute.xlu1 %248  ;;  %v225_v49 = vpop.permute.xlu0 %224 }
  0xbb   : > { %v297_v53 = vsel %vm296_vm3, %v225_v49, %v249_v48 }
  0xbe   : > { %v251_v50 = vpop.permute.xlu1 %250  ;;  %v227_v52 = vpop.permute.xlu0 %226 }
  0xbf   : > { %v298_v51 = vsel %vm296_vm3, %v227_v52, %v251_v50 }
  0xc2   : > { %v275_v54 = vpop.permute.xlu1 %274  ;;  %v273_v55 = vpop.permute.xlu0 %272 }
  0xc3   : > { %v1416_v56 = vsel %vm305_vm4, %v298_v51, %v275_v54  ;;  %v1419_v57 = vsel %vm305_vm4, %v297_v53, %v273_v55 }
  0xc4   : > { %421 = vrot.lane.b32.xlu1 %v1416_v56, %s1105_s29  ;;  %419 = vrot.lane.b32.xlu0 %v1419_v57, %s1105_s29  ;;  %v364_v34 = vmul.f32 2.0, %v1416_v56  ;;  %v363_v35 = vmul.f32 2.0, %v1419_v57 }
  0xc6   : > { %v231_v58 = vpop.permute.xlu1 %230  ;;  %v229_v59 = vpop.permute.xlu0 %228 }
  0xca   : > { %v255_v60 = vpop.permute.xlu1 %254  ;;  %v253_v61 = vpop.permute.xlu0 %252 }
  0xcb   : > { %v300_v62 = vsel %vm296_vm3, %v231_v58, %v255_v60  ;;  %v299_v63 = vsel %vm296_vm3, %v229_v59, %v253_v61 }
  0xce   : > { %v279_v6 = vpop.permute.xlu1 %278  ;;  %v277_v7 = vpop.permute.xlu0 %276 }
  0xcf   : > { %v1428_v8 = vsel %vm305_vm4, %v300_v62, %v279_v6  ;;  %v1431_v9 = vsel %vm305_vm4, %v299_v63, %v277_v7 }
  0xd0   : > { %425 = vrot.lane.b32.xlu1 %v1428_v8, %s1105_s29  ;;  %423 = vrot.lane.b32.xlu0 %v1431_v9, %s1105_s29  ;;  %v366_v36 = vmul.f32 2.0, %v1428_v8  ;;  %v365_v37 = vmul.f32 2.0, %v1431_v9 }
  0xd2   : > { %v235_v10 = vpop.permute.xlu1 %234  ;;  %v233_v11 = vpop.permute.xlu0 %232 }
  0xd6   : > { %v259_v12 = vpop.permute.xlu1 %258  ;;  %v257_v13 = vpop.permute.xlu0 %256 }
  0xd7   : > { %v302_v14 = vsel %vm296_vm3, %v235_v10, %v259_v12  ;;  %v301_v15 = vsel %vm296_vm3, %v233_v11, %v257_v13  ;;  %v1502_v10 = vld [vmem:[%s1259_s25] sm:$0xff]  ;;  %v1505_v11 = vld [vmem:[%s1259_s25 + $0x8] sm:$0xff] }
  0xda   : > { %v283_v16 = vpop.permute.xlu1 %282  ;;  %v281_v17 = vpop.permute.xlu0 %280 }
  0xdb   : > { %v1440_v18 = vsel %vm305_vm4, %v302_v14, %v283_v16  ;;  %v1443_v19 = vsel %vm305_vm4, %v301_v15, %v281_v17 }
  0xdc   : > { %429 = vrot.lane.b32.xlu1 %v1440_v18, %s1105_s29  ;;  %427 = vrot.lane.b32.xlu0 %v1443_v19, %s1105_s29  ;;  %v368_v38 = vmul.f32 2.0, %v1440_v18  ;;  %v367_v40 = vmul.f32 2.0, %v1443_v19 }
  0xde   : > { %v239_v20 = vpop.permute.xlu1 %238  ;;  %v237_v21 = vpop.permute.xlu0 %236 }
  0xe2   : > { %v263_v24 = vpop.permute.xlu1 %262  ;;  %v261_v25 = vpop.permute.xlu0 %260 }
  0xe3   : > { %v304_v29 = vsel %vm296_vm3, %v239_v20, %v263_v24  ;;  %v303_v30 = vsel %vm296_vm3, %v237_v21, %v261_v25  ;;  %v790_v20 = vsub.f32 %v1502_v10, %v1272_v0  ;;  %v791_v21 = vsub.f32 %v1505_v11, %v1279_v1 }
  0xe5   : > { %v799_v0 = vand.u32 2147483647, %v791_v21 }
  0xe6   : > { %v287_v31 = vpop.permute.xlu1 %286  ;;  %v285_v28 = vpop.permute.xlu0 %284 }
  0xe7   : > { %v1452_v32 = vsel %vm305_vm4, %v304_v29, %v287_v31  ;;  %v1455_v33 = vsel %vm305_vm4, %v303_v30, %v285_v28 }
  0xe8   : > { %433 = vrot.lane.b32.xlu1 %v1452_v32, %s1105_s29  ;;  %431 = vrot.lane.b32.xlu0 %v1455_v33, %s1105_s29  ;;  %v370_v41 = vmul.f32 2.0, %v1452_v32  ;;  %v369_v42 = vmul.f32 2.0, %v1455_v33 }
  0xea   : > { %v632_v27 = vpop.permute.xlu1 %631  ;;  %v630_v43 = vpop.permute.xlu0 %629 }
  0xec   : > { %381 = vrot.lane.b32.xlu1 %v364_v34, %s1103_s22  ;;  %379 = vrot.lane.b32.xlu0 %v363_v35, %s1103_s22 }
  0xee   : > { %v656_v44 = vpop.permute.xlu1 %655  ;;  %v654_v45 = vpop.permute.xlu0 %653 }
  0xef   : > { %v678_v62 = vsel %vm296_vm3, %v632_v27, %v656_v44  ;;  %v687_v63 = vsel %vm685_vm5, %v632_v27, %v656_v44  ;;  %v677_v6 = vsel %vm296_vm3, %v630_v43, %v654_v45  ;;  %v686_v7 = vsel %vm685_vm5, %v630_v43, %v654_v45 }
  0xf0   : > { %385 = vrot.lane.b32.xlu1 %v366_v36, %s1103_s22  ;;  %383 = vrot.lane.b32.xlu0 %v365_v37, %s1103_s22  ;;  %v703_v12 = vsub.f32 %v687_v63, %v678_v62  ;;  %v702_v13 = vsub.f32 %v686_v7, %v677_v6 }
  0xf2   : > { %v658_v46 = vpop.permute.xlu1 %657  ;;  %v634_v47 = vpop.permute.xlu0 %633  ;;  %v719_v29 = vmul.f32 %v703_v12, %v703_v12  ;;  %v718_v30 = vmul.f32 %v702_v13, %v702_v13 }
  0xf3   : > { %v679_v31 = vsel %vm296_vm3, %v634_v47, %v658_v46  ;;  %v688_v28 = vsel %vm685_vm5, %v634_v47, %v658_v46 }
  0xf4   : > { %389 = vrot.lane.b32.xlu1 %v368_v38, %s1103_s22  ;;  %387 = vrot.lane.b32.xlu0 %v367_v40, %s1103_s22  ;;  %v704_v6 = vsub.f32 %v688_v28, %v679_v31 }
  0xf6   : > { %v660_v48 = vpop.permute.xlu1 %659  ;;  %v636_v49 = vpop.permute.xlu0 %635 }
  0xf7   : > { %v680_v38 = vsel %vm296_vm3, %v636_v49, %v660_v48  ;;  %v689_v40 = vsel %vm685_vm5, %v636_v49, %v660_v48 }
  0xf8   : > { %393 = vrot.lane.b32.xlu1 %v370_v41, %s1103_s22  ;;  %391 = vrot.lane.b32.xlu0 %v369_v42, %s1103_s22  ;;  %v705_v48 = vsub.f32 %v689_v40, %v680_v38 }
  0xfa   : > { %v1485_v50 = vpop.permute.xlu1 %661  ;;  %v1487_v52 = vpop.permute.xlu0 %637 }
  0xfc   : > { %665 = vrot.lane.b32.xlu1 %v1389_v26, %s1102_s16  ;;  %641 = vrot.lane.b32.xlu0 %v1389_v26, %s1103_s22 }
  0xfe   : > { %v1489_v26 = vpop.permute.xlu1 %663  ;;  %v1491_v53 = vpop.permute.xlu0 %639 }
 0x100   : > { %667 = vrot.lane.b32.xlu1 %v1399_v39, %s1102_s16  ;;  %643 = vrot.lane.b32.xlu0 %v1399_v39, %s1103_s22 }
 0x136   : > { %v422_v51 = vpop.permute.xlu1 %421  ;;  %v420_v39 = vpop.permute.xlu0 %419 }
 0x142   : > { %v426_v54 = vpop.permute.xlu1 %425  ;;  %v424_v55 = vpop.permute.xlu0 %423 }
 0x14e   : > { %v430_v58 = vpop.permute.xlu1 %429  ;;  %v428_v59 = vpop.permute.xlu0 %427 }
 0x15a   : > { %v1493_v60 = vpop.permute.xlu1 %433  ;;  %v1495_v61 = vpop.permute.xlu0 %431 }
 0x15e   : > { %v382_v14 = vpop.permute.xlu1 %381  ;;  %v380_v15 = vpop.permute.xlu0 %379 }
 0x15f   : > { %v404_v16 = vadd.f32 %v382_v14, %v1416_v56  ;;  %v403_v17 = vadd.f32 %v380_v15, %v1419_v57  ;;  %v681_v14 = vsel %vm296_vm3, %v1487_v52, %v1485_v50 }
 0x161   : > { %v444_v24 = vadd.f32 %v422_v51, %v404_v16  ;;  %v443_v25 = vadd.f32 %v420_v39, %v403_v17 }
 0x162   : > { %v386_v34 = vpop.permute.xlu1 %385  ;;  %v384_v35 = vpop.permute.xlu0 %383 }
 0x163   : > { %v574_v36 = vrot.slane %v444_v24, 7  ;;  %v597_v56 = vrot.slane %v444_v24, 1  ;;  %v561_v37 = vrot.slane %v443_v25, 1  ;;  %v573_v57 = vrot.slane %v443_v25, 7 }
 0x164   : > { %v406_v41 = vadd.f32 %v386_v34, %v1428_v8  ;;  %v405_v42 = vadd.f32 %v384_v35, %v1431_v9 }
 0x165   : > { %v617_v27 = vsel %vm475_vm1, %v597_v56, %v574_v36  ;;  %v575_v43 = vsel %vm322_vm0, %v573_v57, %v574_v36  ;;  %v593_v44 = vsel %vm322_vm0, %v561_v37, %v573_v57  ;;  %v598_v45 = vsel %vm475_vm1, %v561_v37, %v597_v56 }
 0x166   : > { %v694_v46 = vsub.f32 %v593_v44, %v598_v45  ;;  %v695_v47 = vsub.f32 %v575_v43, %v617_v27  ;;  %v446_v51 = vadd.f32 %v426_v54, %v406_v41  ;;  %v445_v39 = vadd.f32 %v424_v55, %v405_v42  ;;  %v390_v62 = vpop.permute.xlu1 %389  ;;  %v388_v63 = vpop.permute.xlu0 %387  ;;  %v1552_v44 = vld [vmem:[%s1259_s25 + $0x18] sm:$0xff] }
 0x167   : > { %v408_v8 = vadd.f32 %v390_v62, %v1440_v18  ;;  %v407_v9 = vadd.f32 %v388_v63, %v1443_v19  ;;  %v690_v55 = vsel %vm685_vm5, %v1487_v52, %v1485_v50  ;;  %v691_v50 = vsel %vm685_vm5, %v1491_v53, %v1489_v26 }
 0x168   : > { %v710_v49 = vmul.f32 %v694_v46, %v694_v46  ;;  %v711_v7 = vmul.f32 %v695_v47, %v695_v47  ;;  %v577_v12 = vrot.slane %v446_v51, 7  ;;  %v599_v13 = vrot.slane %v446_v51, 1 }
 0x169   : > { %v562_v15 = vrot.slane %v445_v39, 1  ;;  %v576_v16 = vrot.slane %v445_v39, 7  ;;  %v448_v54 = vadd.f32 %v430_v58, %v408_v8  ;;  %v447_v19 = vadd.f32 %v428_v59, %v407_v9 }
 0x16a   : > { %v1531_v17 = vadd.f32 %v718_v30, %v710_v49  ;;  %v1533_v18 = vadd.f32 %v719_v29, %v711_v7  ;;  %v618_v24 = vsel %vm475_vm1, %v599_v13, %v577_v12  ;;  %v394_v34 = vpop.permute.xlu1 %393  ;;  %v392_v35 = vpop.permute.xlu0 %391  ;;  %v682_v58 = vsel %vm296_vm3, %v1491_v53, %v1489_v26 }
 0x16b   : > { %v578_v25 = vsel %vm322_vm0, %v576_v16, %v577_v12  ;;  %v594_v31 = vsel %vm322_vm0, %v562_v15, %v576_v16  ;;  %v600_v28 = vsel %vm475_vm1, %v562_v15, %v599_v13  ;;  %v580_v52 = vrot.slane %v448_v54, 7 }
 0x16c   : > { %986 = vrsqrt.f32 %v1531_v17  ;;  %v720_v59 = vmul.f32 %v704_v6, %v704_v6  ;;  %v721_v29 = vmul.f32 %v705_v48, %v705_v48  ;;  %v706_v30 = vsub.f32 %v690_v55, %v681_v14 }
 0x16d   : > { %988 = vrsqrt.f32 %v1533_v18  ;;  %v696_v36 = vsub.f32 %v594_v31, %v600_v28  ;;  %v697_v56 = vsub.f32 %v578_v25, %v618_v24  ;;  %v601_v37 = vrot.slane %v448_v54, 1 }
 0x16e   : > { %v563_v57 = vrot.slane %v447_v19, 1  ;;  %v707_v38 = vsub.f32 %v691_v50, %v682_v58  ;;  %v579_v40 = vrot.slane %v447_v19, 7  ;;  %v410_v41 = vadd.f32 %v394_v34, %v1452_v32  ;;  %v666_v39 = vpop.permute.xlu1 %665  ;;  %v642_v32 = vpop.permute.xlu0 %641  ;;  %v210_v50 = vld [vmem:[%s1259_s25 + $0x10] sm:$0xff] }
 0x16f   : > { %v409_v42 = vadd.f32 %v392_v35, %v1455_v33  ;;  %v712_v26 = vmul.f32 %v696_v36, %v696_v36  ;;  %v713_v53 = vmul.f32 %v697_v56, %v697_v56  ;;  %v619_v27 = vsel %vm475_vm1, %v601_v37, %v580_v52 }
 0x170   : > { %v602_v43 = vsel %vm475_vm1, %v563_v57, %v601_v37  ;;  %v581_v45 = vsel %vm322_vm0, %v579_v40, %v580_v52  ;;  %v595_v46 = vsel %vm322_vm0, %v563_v57, %v579_v40  ;;  %v450_v47 = vadd.f32 %v1493_v60, %v410_v41  ;;  %v213_v41 = vld [vmem:[%s1259_s25 + $0x28] sm:$0xff] }
 0x171   : > { %v449_v51 = vadd.f32 %v1495_v61, %v409_v42  ;;  %v1558_v62 = vadd.f32 %v720_v59, %v712_v26  ;;  %v1560_v33 = vadd.f32 %v721_v29, %v713_v53  ;;  %v698_v63 = vsub.f32 %v595_v46, %v602_v43 }
 0x172   : > { %v699_v6 = vsub.f32 %v581_v45, %v619_v27  ;;  %v583_v48 = vrot.slane %v450_v47, 7  ;;  %v603_v8 = vrot.slane %v450_v47, 1  ;;  %v798_v7 = vand.u32 2147483647, %v790_v20  ;;  %v668_v20 = vpop.permute.xlu1 %667  ;;  %v644_v19 = vpop.permute.xlu0 %643  ;;  %v212_v27 = vld [vmem:[%s1259_s25 + $0x20] sm:$0xff] }
 0x173   : > { %v564_v9 = vrot.slane %v449_v51, 1  ;;  %v582_v49 = vrot.slane %v449_v51, 7  ;;  %v793_v60 = vsub.f32 %v1552_v44, %v1290_v2  ;;  %990 = vrsqrt.f32 %v1558_v62 }
 0x174   : > { %v722_v61 = vmul.f32 %v706_v30, %v706_v30  ;;  %v723_v12 = vmul.f32 %v707_v38, %v707_v38  ;;  %992 = vrsqrt.f32 %v1560_v33  ;;  %v683_v13 = vsel %vm296_vm3, %v642_v32, %v666_v39 }
 0x175   : > { %v714_v14 = vmul.f32 %v698_v63, %v698_v63  ;;  %v715_v15 = vmul.f32 %v699_v6, %v699_v6  ;;  %v596_v16 = vsel %vm322_vm0, %v564_v9, %v582_v49  ;;  %v604_v54 = vsel %vm475_vm1, %v564_v9, %v603_v8 }
 0x176   : > { %v700_v10 = vsub.f32 %v596_v16, %v604_v54  ;;  %v692_v2 = vsel %vm685_vm5, %v642_v32, %v666_v39  ;;  %v584_v55 = vsel %vm322_vm0, %v582_v49, %v583_v48  ;;  %v620_v28 = vsel %vm475_vm1, %v603_v8, %v583_v48 }
 0x177   : > { %v1577_v24 = vadd.f32 %v722_v61, %v714_v14  ;;  %v1579_v25 = vadd.f32 %v723_v12, %v715_v15  ;;  %v708_v31 = vsub.f32 %v692_v2, %v683_v13  ;;  %vm736_vm7 = vcmp.eq.f32.partialorder %v1531_v17, inf }
 0x178   : > { %vm738_vm8 = vcmp.eq.f32.partialorder %v1531_v17, 0.0  ;;  %v716_v1 = vmul.f32 %v700_v10, %v700_v10  ;;  %v684_v35 = vsel %vm296_vm3, %v644_v19, %v668_v20  ;;  %v693_v58 = vsel %vm685_vm5, %v644_v19, %v668_v20 }
 0x179   : > { %v987_v34 = vpop.eup %986  ;;  %994 = vrsqrt.f32 %v1577_v24  ;;  %v739_v52 = vand.u32 2147483648, %v1531_v17  ;;  %v701_v29 = vsub.f32 %v584_v55, %v620_v28  ;;  %vm743_vm9 = vcmp.eq.f32.partialorder %v1533_v18, inf  ;;  %v215_v55 = vld [vmem:[%s1259_s25 + $0x38] sm:$0xff] }
 0x17a   : > { %v989_v11 = vpop.eup %988  ;;  %v735_v21 = vmul.f32 %v987_v34, %v1531_v17  ;;  %996 = vrsqrt.f32 %v1579_v25  ;;  %v746_v36 = vand.u32 2147483648, %v1533_v18  ;;  %v724_v56 = vmul.f32 %v708_v31, %v708_v31 }
 0x17b   : > { %v742_v59 = vmul.f32 %v989_v11, %v1533_v18  ;;  %vm745_vm10 = vcmp.eq.f32.partialorder %v1533_v18, 0.0  ;;  %v709_v38 = vsub.f32 %v693_v58, %v684_v35  ;;  %v792_v40 = vsub.f32 %v210_v50, %v1293_v3 }
 0x17c   : > { %v737_v30 = vsel %vm736_vm7, %v1531_v17, %v735_v21  ;;  %v1601_v53 = vadd.f32 %v724_v56, %v716_v1  ;;  %v717_v44 = vmul.f32 %v701_v29, %v701_v29  ;;  %v801_v47 = vand.u32 2147483647, %v793_v60 }
 0x17d   : > { %v740_v37 = vsel %vm738_vm8, %v739_v52, %v737_v30  ;;  %v744_v57 = vsel %vm743_vm9, %v1533_v18, %v742_v59  ;;  %v725_v45 = vmul.f32 %v709_v38, %v709_v38  ;;  %v795_v18 = vsub.f32 %v213_v41, %v1308_v4  ;;  %v214_v4 = vld [vmem:[%s1259_s25 + $0x30] sm:$0xff] }
 0x17e   : > { %v747_v42 = vsel %vm745_vm10, %v746_v36, %v744_v57  ;;  %v806_v26 = vmul.f32 %v798_v7, %v740_v37  ;;  %998 = vrsqrt.f32 %v1601_v53  ;;  %v800_v32 = vand.u32 2147483647, %v792_v40 }
 0x17f   : > { %v807_v43 = vmul.f32 %v799_v0, %v747_v42  ;;  %v1608_v51 = vadd.f32 %v725_v45, %v717_v44  ;;  %v794_v63 = vsub.f32 %v212_v27, %v1311_v5  ;;  %vm750_vm11 = vcmp.eq.f32.partialorder %v1558_v62, inf }
 0x180   : > { %v815_v46 = vsel %vm814_vm6, %v806_v26, 0.0  ;;  %v991_v17 = vpop.eup %990  ;;  %v753_v8 = vand.u32 2147483648, %v1558_v62  ;;  %vm752_vm12 = vcmp.eq.f32.partialorder %v1558_v62, 0.0  ;;  %vm757_vm13 = vcmp.eq.f32.partialorder %v1560_v33, inf }
 0x181   : > { %v816_v3 = vsel %vm814_vm6, %v807_v43, 0.0  ;;  %v993_v39 = vpop.eup %992  ;;  %v749_v48 = vmul.f32 %v991_v17, %v1558_v62  ;;  %1000 = vrsqrt.f32 %v1608_v51  ;;  %v760_v5 = vand.u32 2147483648, %v1560_v33 }
 0x182   : > { %v817_v6 = vadd.f32 %v816_v3, %v815_v46  ;;  %v756_v9 = vmul.f32 %v993_v39, %v1560_v33  ;;  %vm759_vm14 = vcmp.eq.f32.partialorder %v1560_v33, 0.0  ;;  %v803_v14 = vand.u32 2147483647, %v795_v18 }
 0x183   : > { %v751_v49 = vsel %vm750_vm11, %v1558_v62, %v749_v48  ;;  %v796_v15 = vsub.f32 %v214_v4, %v1340_v23  ;;  %v802_v0 = vand.u32 2147483647, %v794_v63  ;;  %vm764_vm15 = vcmp.eq.f32.partialorder %v1577_v24, inf }
 0x184   : > { %v754_v7 = vsel %vm752_vm12, %v753_v8, %v751_v49  ;;  %v758_v60 = vsel %vm757_vm13, %v1560_v33, %v756_v9  ;;  %vm766_vm0 = vcmp.eq.f32.partialorder %v1577_v24, 0.0  ;;  %v767_v33 = vand.u32 2147483648, %v1577_v24 }
 0x185   : > { %v761_v61 = vsel %vm759_vm14, %v760_v5, %v758_v60  ;;  %v808_v12 = vmul.f32 %v800_v32, %v754_v7  ;;  %vm771_vm1 = vcmp.eq.f32.partialorder %v1579_v25, inf  ;;  %v774_v31 = vand.u32 2147483648, %v1579_v25 }
 0x186   : > { %v995_v13 = vpop.eup %994  ;;  %v809_v16 = vmul.f32 %v801_v47, %v761_v61  ;;  %vm773_vm2 = vcmp.eq.f32.partialorder %v1579_v25, 0.0  ;;  %v797_v58 = vsub.f32 %v215_v55, %v1337_v22  ;;  %v804_v52 = vand.u32 2147483647, %v796_v15 }
 0x187   : > { %v997_v54 = vpop.eup %996  ;;  %v818_v62 = vsel %vm814_vm6, %v808_v12, 0.0  ;;  %v763_v10 = vmul.f32 %v995_v13, %v1577_v24  ;;  %vm778_vm3 = vcmp.eq.f32.partialorder %v1601_v53, inf  ;;  %v781_v30 = vand.u32 2147483648, %v1601_v53 }
 0x188   : > { %v819_v2 = vadd.f32 %v818_v62, %v817_v6  ;;  %v770_v20 = vmul.f32 %v997_v54, %v1579_v25  ;;  %v820_v19 = vsel %vm814_vm6, %v809_v16, 0.0  ;;  %vm780_vm4 = vcmp.eq.f32.partialorder %v1601_v53, 0.0 }
 0x189   : > { %v765_v23 = vsel %vm764_vm15, %v1577_v24, %v763_v10  ;;  %v805_v37 = vand.u32 2147483647, %v797_v58  ;;  %vm785_vm5 = vcmp.eq.f32.partialorder %v1608_v51, inf  ;;  %v788_v41 = vand.u32 2147483648, %v1608_v51 }
 0x18a   : > { %v768_v28 = vsel %vm766_vm0, %v767_v33, %v765_v23  ;;  %v772_v34 = vsel %vm771_vm1, %v1579_v25, %v770_v20  ;;  %v821_v1 = vadd.f32 %v820_v19, %v819_v2  ;;  %vm787_vm7 = vcmp.eq.f32.partialorder %v1608_v51, 0.0 }
 0x18b   : > { %v775_v11 = vsel %vm773_vm2, %v774_v31, %v772_v34  ;;  %v810_v21 = vmul.f32 %v802_v0, %v768_v28  ;;  %v999_v35 = vpop.eup %998  ;;  %vm836_vm8 = vcmask 122880  }
 0x18c   : > { %v811_v50 = vmul.f32 %v803_v14, %v775_v11  ;;  %v777_v24 = vmul.f32 %v999_v35, %v1601_v53 }
 0x18d   : > { %v822_v59 = vsel %vm814_vm6, %v810_v21, 0.0 }
 0x18e   : > { %v823_v29 = vadd.f32 %v822_v59, %v821_v1  ;;  %v1001_v36 = vpop.eup %1000  ;;  %v824_v25 = vsel %vm814_vm6, %v811_v50, 0.0  ;;  %v779_v56 = vsel %vm778_vm3, %v1601_v53, %v777_v24 }
 0x18f   : > { %v782_v57 = vsel %vm780_vm4, %v781_v30, %v779_v56  ;;  %v784_v38 = vmul.f32 %v1001_v36, %v1608_v51 }
 0x190   : > { %v825_v22 = vadd.f32 %v824_v25, %v823_v29  ;;  %v812_v40 = vmul.f32 %v804_v52, %v782_v57 }
 0x191   : > { %v786_v42 = vsel %vm785_vm5, %v1608_v51, %v784_v38 }
 0x192   : > { %v826_v26 = vsel %vm814_vm6, %v812_v40, 0.0  ;;  %v789_v27 = vsel %vm787_vm7, %v788_v41, %v786_v42 }
 0x193   : > { %v827_v53 = vadd.f32 %v826_v26, %v825_v22  ;;  %v813_v43 = vmul.f32 %v805_v37, %v789_v27 }
 0x195   : > { %v828_v44 = vsel %vm814_vm6, %v813_v43, 0.0 }
 0x196   : > { %v829_v45 = vadd.f32 %v828_v44, %v827_v53 }
 0x198   : > { %v830_v46 = vrot.slane %v829_v45, 4 }
 0x19a   : > { %v831_v17 = vadd.f32 %v830_v46, %v829_v45 }
 0x19c   : > { %v832_v47 = vrot.slane %v831_v17, 2 }
 0x19e   : > { %v833_v18 = vadd.f32 %v832_v47, %v831_v17 }
 0x1a0   : > { %v834_v3 = vrot.slane %v833_v18, 1 }
 0x1a2   : > { %v835_v51 = vadd.f32 %v834_v3, %v833_v18 }
 0x1a4   : > { %837 = vst.msk [vmem:[%s199_s24] sm:$0x1] %vm836_vm8, %v835_v51 }
 0x1a5 PF: > { %p15_p11 = scmp.ge.s32.totalorder %s1143_s14, 4   ;;  %s1679_s9 = smov %s1088_s10 }
 0x1a6   : > { %s1680_s10 = smov %s1092_s11  ;;  %s1681_s11 = smov %s1153_s17 }
 0x1a7   : > { %s1682_s12 = smov %s1143_s14  ;;  %17 = sbr.rel (!%p15_p11) target bundleno = 5 (0x5), region = 81 }
 0x1ac   :  { %855 = vsyncpa [#allocation3], 1 }
 0x1ad   :  { %857 = vsyncpa [#allocation3 + $0x1], 1 }
 0x1ae   :  { %858 = vsyncpa [#allocation5], 1 }
 0x1af   :  { %860 = vsyncpa [#allocation5 + $0x1], 1 }

</bundles_post_ra>
